<compile_context>
chip_gen: v6e
topology: v6e:2x2x1
jax: 0.10.0
libtpu: 0.0.40
codegen_flags: <defaults>
</compile_context>

<pallas_src>
import functools

import jax
import jax.numpy as jnp
from jax.experimental import pallas as pl
from jax.experimental.pallas import tpu as pltpu

BN_EPS = 1e-5
LANE = 128


def _round_up(a, b):
    return (a + b - 1) // b * b


def _cdiv(a, b):
    return -(-a // b)


def _stats_kernel(x_ref, colsum_ref, xtx_ref):
    """Pass 1: per-core partial colsum(x) and x^T @ x, accumulated in f32."""
    @pl.when(pl.program_id(1) == 0)
    def _():
        colsum_ref[...] = jnp.zeros_like(colsum_ref)
        xtx_ref[...] = jnp.zeros_like(xtx_ref)

    x = x_ref[...]                                            # (TM, in_num) f32
    colsum_ref[...] += jnp.sum(x, axis=0, keepdims=True).reshape(colsum_ref.shape)
    xtx = jax.lax.dot_general(x, x, (((0,), (0,)), ((), ())),
                              preferred_element_type=jnp.float32)
    xtx_ref[...] += xtx.reshape(xtx_ref.shape)


def _apply_kernel(x_ref, w1_ref, colsum_ref, xtx_ref, gamma_ref, beta_ref,
                  w2_ref, b2_ref, o_ref, scale_sc, shift_sc, *, inv_m):
    """Pass 2: fold BN once per core, then relu(g*scale+shift) @ w2 + b2."""
    @pl.when(pl.program_id(1) == 0)
    def _():
        w1f = w1_ref[...]                                     # (in_num, inter_p) f32
        sum_g = jnp.dot(colsum_ref[...], w1f,
                        preferred_element_type=jnp.float32)   # (1, inter_p)
        xtw = jnp.dot(xtx_ref[...], w1f,
                      preferred_element_type=jnp.float32)     # (in_num, inter_p)
        ssq_g = jnp.sum(xtw * w1f, axis=0, keepdims=True)     # E[g^2]*M per channel
        mean_g = sum_g * inv_m
        var_g = jnp.maximum(ssq_g * inv_m - mean_g * mean_g, 0.0)  # biased (PyTorch BN)
        inv_std = jax.lax.rsqrt(var_g + BN_EPS)
        scale = gamma_ref[...] * inv_std
        scale_sc[...] = scale
        shift_sc[...] = beta_ref[...] - mean_g * scale        # Linear-1 bias cancels

    g = jnp.dot(x_ref[...].astype(jnp.bfloat16),
                w1_ref[...].astype(jnp.bfloat16),
                preferred_element_type=jnp.float32)           # (TM, inter_p)
    h = jnp.maximum(g * scale_sc[...] + shift_sc[...], 0.0)   # folded BN + ReLU (f32)
    out = jnp.dot(h.astype(jnp.bfloat16), w2_ref[...],
                  preferred_element_type=jnp.float32) + b2_ref[...]   # (TM, out_p)
    # Store only the real output lanes (HBM array is unpadded).
    o_ref[...] = out[:, :o_ref.shape[1]].astype(o_ref.dtype)


def out_layer_forward(x, w1, b1, gamma, beta, w2, b2, node_num, out_window):
    """x: (B, node_num, in_num) -> (B, node_num, out_window).
    Weights are pre-transposed: w1 (in_num, inter), w2 (inter, out_window).
    NOTE: b1 cancels exactly against the BatchNorm batch mean (training mode),
    so it does not influence the forward output."""
    del b1
    B, N, in_num = x.shape
    assert N == node_num
    M = B * N
    inter = w1.shape[1]

    inter_p = _round_up(inter, LANE)
    out_p = _round_up(out_window, LANE)

    # ---- generation-aware tile size (v7x: 64 MiB/TC; v5e/v6e: 128 MiB) ----
    try:
        vmem_cap = int(getattr(pltpu.get_tpu_info(), "vmem_capacity_bytes", 64 << 20))
    except Exception:
        vmem_cap = 64 << 20
    vmem_budget = min(int(vmem_cap * 0.6), 96 << 20)

    resident = (in_num * inter_p * 4        # w1 (f32, resident)
                + inter_p * out_p * 2       # w2 (bf16, resident)
                + in_num * in_num * 4       # XtX
                + 6 * inter_p * 4 + 2 * out_p * 4
                + (2 << 20))                # compiler scratch slack
    per_row = (8 * in_num + 8 * out_window  # double-buffered x / out f32 tiles
               + 12 * inter_p + 4 * out_p   # g / h / bf16 casts / padded out
               + 2 * in_num + 64)
    tm_cap = max((vmem_budget - resident) // per_row, 8)
    tm_pref = max(8, min(2048, int(tm_cap)) // 8 * 8)
    tm_small = _round_up(max(1, _cdiv(M, 2)), 8)   # keep >= 2 tiles when M is small
    TM = min(tm_pref, tm_small)

    n_tiles = max(2, _cdiv(M, TM))
    if n_tiles % 2:
        n_tiles += 1                                # even -> both v7x cores loaded
    Mp = n_tiles * TM
    half = n_tiles // 2
    vmem_limit = int(max(vmem_budget, 16 << 20))

    # ---- pad operands (zero-padded rows/channels are inert) ----
    x2d = x.reshape(M, in_num).astype(jnp.float32)
    if Mp > M:
        x2d = jnp.pad(x2d, ((0, Mp - M), (0, 0)))
    w1p = jnp.pad(w1.astype(jnp.float32), ((0, 0), (0, inter_p - inter)))
    w2p = jnp.pad(w2.astype(jnp.float32),
                  ((0, inter_p - inter), (0, out_p - out_window))).astype(jnp.bfloat16)
    gmp = jnp.pad(gamma.reshape(1, -1).astype(jnp.float32), ((0, 0), (0, inter_p - inter)))
    btp = jnp.pad(beta.reshape(1, -1).astype(jnp.float32), ((0, 0), (0, inter_p - inter)))
    b2p = jnp.pad(b2.reshape(1, -1).astype(jnp.float32), ((0, 0), (0, out_p - out_window)))

    # ---- pass 1: per-core partial colsum(x) and x^T x ----
    colsum_parts, xtx_parts = pl.pallas_call(
        _stats_kernel,
        out_shape=(jax.ShapeDtypeStruct((2, 1, in_num), jnp.float32),
                   jax.ShapeDtypeStruct((2, in_num, in_num), jnp.float32)),
        grid=(2, half),
        in_specs=[pl.BlockSpec((TM, in_num), lambda c, i: (c * half + i, 0))],
        out_specs=(pl.BlockSpec((1, 1, in_num), lambda c, i: (c, 0, 0)),
                   pl.BlockSpec((1, in_num, in_num), lambda c, i: (c, 0, 0))),
        compiler_params=pltpu.CompilerParams(
            dimension_semantics=("parallel", "arbitrary"),
            vmem_limit_bytes=vmem_limit),
    )(x2d)

    colsum = colsum_parts.sum(axis=0)       # (1, in_num)
    xtx = xtx_parts.sum(axis=0)             # (in_num, in_num)

    # ---- pass 2: in-kernel BN fold + ReLU + Linear2, unpadded output ----
    out2d = pl.pallas_call(
        functools.partial(_apply_kernel, inv_m=1.0 / M),
        out_shape=jax.ShapeDtypeStruct((Mp, out_window), jnp.float32),
        grid=(2, half),
        in_specs=[pl.BlockSpec((TM, in_num), lambda c, i: (c * half + i, 0)),
                  pl.BlockSpec((in_num, inter_p), lambda c, i: (0, 0)),
                  pl.BlockSpec((1, in_num), lambda c, i: (0, 0)),
                  pl.BlockSpec((in_num, in_num), lambda c, i: (0, 0)),
                  pl.BlockSpec((1, inter_p), lambda c, i: (0, 0)),
                  pl.BlockSpec((1, inter_p), lambda c, i: (0, 0)),
                  pl.BlockSpec((inter_p, out_p), lambda c, i: (0, 0)),
                  pl.BlockSpec((1, out_p), lambda c, i: (0, 0))],
        out_specs=pl.BlockSpec((TM, out_window), lambda c, i: (c * half + i, 0)),
        scratch_shapes=[pltpu.VMEM((1, inter_p), jnp.float32),
                        pltpu.VMEM((1, inter_p), jnp.float32)],
        compiler_params=pltpu.CompilerParams(
            dimension_semantics=("parallel", "arbitrary"),
            vmem_limit_bytes=vmem_limit),
    )(x2d, w1p, colsum, xtx, gmp, btp, w2p, b2p)

    return out2d[:M].reshape(B, node_num, out_window)


def _init_linear(key, fan_in, fan_out):
    # Deterministic init mimicking PyTorch's default uniform(-1/sqrt(fan_in), ...)
    kw, kb = jax.random.split(key)
    bound = 1.0 / jnp.sqrt(float(fan_in))
    w = jax.random.uniform(kw, (fan_in, fan_out), jnp.float32, -bound, bound)
    b = jax.random.uniform(kb, (fan_out,), jnp.float32, -bound, bound)
    return w, b


if __name__ == "__main__":
    # Small config consistent with the module (layer_num=2); non-multiples of
    # 8/128 chosen on purpose to exercise the padding / masked-store paths.
    B, node_num, in_num, inter_num, out_window = 2, 5, 16, 48, 7

    key = jax.random.PRNGKey(0)
    kx, k1, k2, kg, kb = jax.random.split(key, 5)

    x = jax.random.normal(kx, (B, node_num, in_num), jnp.float32)
    w1, b1 = _init_linear(k1, in_num, inter_num)        # Linear(in_num -> inter)
    gamma = 1.0 + 0.1 * jax.random.normal(kg, (inter_num,), jnp.float32)
    beta = 0.1 * jax.random.normal(kb, (inter_num,), jnp.float32)
    w2, b2 = _init_linear(k2, inter_num, out_window)    # Linear(inter -> out_window)

    out = out_layer_forward(x, w1, b1, gamma, beta, w2, b2,
                            node_num=node_num, out_window=out_window)
    out = jax.block_until_ready(out)

    # Pure-JAX reference replicating the module's training-mode forward
    # (bf16 MXU matmuls, f32 batch statistics).
    M = B * node_num
    x2d = x.reshape(M, in_num)
    g = jnp.dot(x2d.astype(jnp.bfloat16), w1.astype(jnp.bfloat16),
                preferred_element_type=jnp.float32)
    h_lin = g + b1
    mu = h_lin.mean(axis=0, keepdims=True)
    var = ((h_lin - mu) ** 2).mean(axis=0, keepdims=True)
    h = (h_lin - mu) * jax.lax.rsqrt(var + BN_EPS) * gamma + beta
    h = jnp.maximum(h, 0.0)
    ref = (jnp.dot(h.astype(jnp.bfloat16), w2.astype(jnp.bfloat16),
                   preferred_element_type=jnp.float32) + b2)
    ref = ref.reshape(B, node_num, out_window)

    assert out.shape == (B, node_num, out_window)
    max_err = float(jnp.max(jnp.abs(out - ref)))
    assert jnp.allclose(out, ref, atol=2e-2, rtol=2e-2), max_err

    print("KERNEL_OK")
</pallas_src>

<mosaic_0001>
module attributes {stable_mosaic.version = 11 : i64} {
  func.func @_stats_kernel(%arg0: i32, %arg1: i32, %arg2: memref<8x16xf32, #tpu.memory_space<vmem>>, %arg3: memref<1x1x16xf32, #tpu.memory_space<vmem>>, %arg4: memref<1x16x16xf32, #tpu.memory_space<vmem>>) attributes {dimension_semantics = [#tpu.dimension_semantics<parallel>, #tpu.dimension_semantics<arbitrary>], iteration_bounds = array<i64: 2, 1>, scalar_prefetch = 0 : i64, scratch_operands = 0 : i64, tpu.core_type = #tpu.core_type<tc>, window_params = [{transform_indices = @transform_0, window_bounds = array<i64: 8, 16>}, {transform_indices = @transform_1, window_bounds = array<i64: 1, 1, 16>}, {transform_indices = @transform_2, window_bounds = array<i64: 1, 16, 16>}]} {
    %c0_i32 = arith.constant 0 : i32
    %0 = arith.cmpi eq, %arg1, %c0_i32 : i32
    %1 = arith.extui %0 : i1 to i32
    %c0_i32_0 = arith.constant 0 : i32
    %2 = arith.cmpi ne, %1, %c0_i32_0 : i32
    scf.if %2 {
      %cst_15 = arith.constant 0.000000e+00 : f32
      %15 = vector.broadcast %cst_15 : f32 to vector<1x1x16xf32>
      %c0_16 = arith.constant 0 : index
      %c0_17 = arith.constant 0 : index
      %c0_18 = arith.constant 0 : index
      %16 = vector.load %arg3[%c0_16, %c0_17, %c0_18] : memref<1x1x16xf32, #tpu.memory_space<vmem>>, vector<1x1x16xf32>
      tpu.vector_store %arg3[%c0_16, %c0_17, %c0_18], %15 {strides = array<i32>} : memref<1x1x16xf32, #tpu.memory_space<vmem>>, vector<1x1x16xf32>,
      %cst_19 = arith.constant 0.000000e+00 : f32
      %17 = vector.broadcast %cst_19 : f32 to vector<1x16x16xf32>
      %c0_20 = arith.constant 0 : index
      %c0_21 = arith.constant 0 : index
      %c0_22 = arith.constant 0 : index
      %18 = vector.load %arg4[%c0_20, %c0_21, %c0_22] : memref<1x16x16xf32, #tpu.memory_space<vmem>>, vector<1x16x16xf32>
      tpu.vector_store %arg4[%c0_20, %c0_21, %c0_22], %17 {strides = array<i32>} : memref<1x16x16xf32, #tpu.memory_space<vmem>>, vector<1x16x16xf32>,
    } else {
    }
    %c0 = arith.constant 0 : index
    %c0_1 = arith.constant 0 : index
    %3 = vector.load %arg2[%c0, %c0_1] : memref<8x16xf32, #tpu.memory_space<vmem>>, vector<8x16xf32>
    %c0_2 = arith.constant 0 : index
    %c0_3 = arith.constant 0 : index
    %c0_4 = arith.constant 0 : index
    %4 = vector.load %arg3[%c0_2, %c0_3, %c0_4] : memref<1x1x16xf32, #tpu.memory_space<vmem>>, vector<1x1x16xf32>
    %cst = arith.constant dense<0.000000e+00> : vector<16xf32>
    %5 = vector.multi_reduction <add>, %3, %cst [0] : vector<8x16xf32> to vector<16xf32>
    %6 = vector.shape_cast %5 : vector<16xf32> to vector<1x16xf32>
    %7 = vector.shape_cast %6 : vector<1x16xf32> to vector<1x1x16xf32>
    %8 = arith.addf %4, %7 : vector<1x1x16xf32>
    %c0_5 = arith.constant 0 : index
    %c0_6 = arith.constant 0 : index
    %c0_7 = arith.constant 0 : index
    %9 = vector.load %arg3[%c0_5, %c0_6, %c0_7] : memref<1x1x16xf32, #tpu.memory_space<vmem>>, vector<1x1x16xf32>
    tpu.vector_store %arg3[%c0_5, %c0_6, %c0_7], %8 {strides = array<i32>} : memref<1x1x16xf32, #tpu.memory_space<vmem>>, vector<1x1x16xf32>,
    %cst_8 = arith.constant dense<0.000000e+00> : vector<16x16xf32>
    %10 = tpu.matmul %3, %3, %cst_8 {dimension_numbers = #tpu.dot_dimension_numbers<[0], [0], [1], [1], [0, 1, 1, 1], [], []>} : vector<8x16xf32>, vector<8x16xf32>, vector<16x16xf32> -> vector<16x16xf32>
    %c0_9 = arith.constant 0 : index
    %c0_10 = arith.constant 0 : index
    %c0_11 = arith.constant 0 : index
    %11 = vector.load %arg4[%c0_9, %c0_10, %c0_11] : memref<1x16x16xf32, #tpu.memory_space<vmem>>, vector<1x16x16xf32>
    %12 = vector.shape_cast %10 : vector<16x16xf32> to vector<1x16x16xf32>
    %13 = arith.addf %11, %12 : vector<1x16x16xf32>
    %c0_12 = arith.constant 0 : index
    %c0_13 = arith.constant 0 : index
    %c0_14 = arith.constant 0 : index
    %14 = vector.load %arg4[%c0_12, %c0_13, %c0_14] : memref<1x16x16xf32, #tpu.memory_space<vmem>>, vector<1x16x16xf32>
    tpu.vector_store %arg4[%c0_12, %c0_13, %c0_14], %13 {strides = array<i32>} : memref<1x16x16xf32, #tpu.memory_space<vmem>>, vector<1x16x16xf32>,
    return
  }
  func.func @transform_0(%arg0: i32, %arg1: i32) -> (i32, i32) {
    %c1_i32 = arith.constant 1 : i32
    %0 = arith.muli %arg0, %c1_i32 : i32
    %1 = arith.addi %0, %arg1 : i32
    %c0_i32 = arith.constant 0 : i32
    %c0_i32_0 = arith.constant 0 : i32
    return %1, %c0_i32 : i32, i32
  }
  func.func @transform_1(%arg0: i32, %arg1: i32) -> (i32, i32, i32) {
    %c0_i32 = arith.constant 0 : i32
    %c0_i32_0 = arith.constant 0 : i32
    %c0_i32_1 = arith.constant 0 : i32
    return %arg0, %c0_i32, %c0_i32_0 : i32, i32, i32
  }
  func.func @transform_2(%arg0: i32, %arg1: i32) -> (i32, i32, i32) {
    %c0_i32 = arith.constant 0 : i32
    %c0_i32_0 = arith.constant 0 : i32
    %c0_i32_1 = arith.constant 0 : i32
    return %arg0, %c0_i32, %c0_i32_0 : i32, i32, i32
  }
}

</mosaic_0001>

<bundles_post_ra>
// kernel: tpu_custom_call.1
= control target key start
LH: loop header
LB: loop body
LE: loop exit
PB: predicated region body
PF: predicated region fallthrough
CT: control target
= control target key end

     0   :  { %8 = vsyncpa [#allocation3], 0  ;;  %s906_s0 = inlined_call_operand.hbm [shape: f32[16,16], index: 0, kind: input, shape index: {}]   ;;  %s907_s1 = inlined_call_operand.hbm [shape: f32[2,1,16], index: 1, kind: output, shape index: {0}]   ;;  %s908_s2 = inlined_call_operand.hbm [shape: f32[2,16,16], index: 2, kind: output, shape index: {1}]  }
   0x1   :  { %10 = vsyncpa [#allocation3 + $0x1], 0 }
   0x2   :  { %11 = vsyncpa [#allocation4], 0 }
   0x3   :  { %13 = vsyncpa [#allocation4 + $0x1], 0 }
   0x4   :  { %14 = vsyncpa [#allocation7], 0 }
   0x5   :  { %16 = vsyncpa [#allocation7 + $0x1], 0  ;;  %s725_s9 = smov 0   ;;  %s727_s10 = smov 0  }
   0x6   :  { %s729_s11 = smov 0   ;;  %s731_s12 = smov 0  }
   0x7   :  { %s733_s13 = smov 0   ;;  %s735_s14 = smov 0  }
   0x8 LB: > { %s468_s15 = sadd.s32 4294967295, %s702_s14   ;;  %s469_s16 = sadd.s32 4294967294, %s702_s14   ;;  %s702_s14 = sphi %s735_s14, %s22_s14   ;;  %s698_s13 = sphi %s733_s13, %s920_s13   ;;  %s694_s12 = sphi %s731_s12, %s919_s12   ;;  %s690_s11 = sphi %s729_s11, %s918_s11   ;;  %s686_s10 = sphi %s727_s10, %s917_s10   ;;  %s682_s9 = sphi %s725_s9, %s916_s9  }
   0x9   : > { %s34_s17 = sadd.s32 1, %s698_s13  ;;  %s43_s18 = sadd.s32 1, %s690_s11 }
   0xa   : > { %p36_p0 = scmp.ge.s32.totalorder %s34_s17, 2  ;;  %p50_p1 = scmp.ne.s32.totalorder %s690_s11, %s686_s10 }
   0xb   : > { %p51_p2 = scmp.eq.s32.totalorder %s702_s14, 0  ;;  %p56_p3 = scmp.ne.s32.totalorder %s686_s10, %s682_s9 }
   0xc   : > { %s922_s17 = smov (%p36_p0, %s34_s17), 0  ;;  %p57_p5 = scmp.eq.s32.totalorder %s468_s15, 0 }
   0xd   : > { %p766_p4 = por %p51_p2, %p50_p1  ;;  %s40_s20 = ssub.s32 %s698_s13, %s922_s17 }
   0xe   : > { %p80_p6 = scmp.eq.s32.totalorder %s468_s15, 1  ;;  %p41_p7 = scmp.eq.s32.totalorder %s40_s20, 0 }
   0xf   : > { %p772_p8 = por %p57_p5, %p56_p3  ;;  %p86_p10 = scmp.eq.s32.totalorder %s469_s16, 1 }
  0x10   : > { %p776_p9 = por %p80_p6, %p50_p1  ;;  %p511_p13 = scmp.lt.s32.totalorder %s702_s14, 2 }
  0x11   : > { %s781_s23 = scalar_select %p41_p7, %s690_s11, %s43_s18  }
  0x12   : > { %p783_p11 = por %p86_p10, %p56_p3  ;;  %s132_s25 = sand.u32 1, %s690_s11  }
  0x13   : > { %s472_s26 = sshll.u32 %s132_s25, 3  ;;  %s473_s27 = sshll.u32 %s698_s13, 7 }
  0x14   : > { %s912_s24 = scalar_select %p783_p11, 1, 0 }
  0x15   : > { %s142_s30 = scalar_lea.hbm %s906_s0, %s473_s27  ;;  %s136_s3 = scalar_lea.vmem [#allocation2], %s472_s26 }
  0x16   : > { %s144_s4 = sshll.u32 %s136_s3, 4  ;;  %p796_p0 = pnand %p511_p13, %p766_p4  ;;  %s145_s4 = int_to_ptr.vmem [resolvable:$true] %s144_s4 }
  0x17   : > { %p474_p1 = scmp.ge.s32.totalorder %s702_s14, 1  ;;  %p149_p2 = scmp.lt.s32.totalorder %s702_s14, 3 }
  0x18   : > { %s133_s6 = scalar_lea.sflag [#allocation3], %s132_s25  ;;  %p566_p3 = pneg %p796_p0 }
  0x19   : > { %s577_s7 = scalar_lea.vmem %s145_s4, 128  ;;  %s704_s8 = smov [#allocation2]  }
  0x1a   : > { %p578_p5 = scmp.ne.s32.totalorder %s145_s4, %s577_s7  ;;  %s582_s15 = sshll.u32 %s704_s8, 4  ;;  %s583_s15 = int_to_ptr.vmem [resolvable:$false] %s582_s15 }
  0x1b   : > { %s584_s16 = scalar_lea.vmem %s583_s15, 256  ;;  %p585_p10 = scmp.lt.s32.totalorder %s145_s4, %s583_s15 }
  0x1c   : > { %p580_p6 = pnand %p578_p5, %p566_p3  ;;  %p586_p12 = scmp.lt.s32.totalorder %s584_s16, %s577_s7 }
  0x1e   : > { %p581_p7 = pneg %p580_p6  ;;  %p587_p4 = por %p586_p12, %p585_p10 }
  0x20   : > { %p588_p13 = pnand %p587_p4, %p581_p7 }
  0x22   : > { %591 = shalt.err (!%p588_p13)
}
  0x23   : > { %503 = dma.hbm_to_vmem [thread:$0]  (!%p796_p0), %s142_s30, 128, %s145_s4, %s133_s6  }
  0x24   : > { %p150_p11 = pnand %p474_p1, %p149_p2 }
  0x25   : > { %s811_s18 = sand.u32 (!%p150_p11), 1, %s686_s10  }
  0x26   : > { %153 = sbr.rel (%p150_p11) target bundleno = 385 (0x181), region = 24  ;;  %s475_s19 = sshll.u32 (!%p150_p11), %s811_s18, 3 }
  0x27   : > { %s156_s20 = scalar_lea.sflag (!%p150_p11), [#allocation3], %s811_s18  ;;  %s159_s25 = scalar_lea.vmem (!%p150_p11), [#allocation2], %s475_s19 }
  0x2b   : > { %669 = dma.done.wait (%p772_p8), %s156_s20, 128  }
  0x2c   : > { %671 = vsyncadd (%p772_p8), %s156_s20, 4294967168  ;;  %v194_v0 = vld [vmem:[%s159_s25] sm:$0xff]  ;;  %s476_s26 = sshll.u32 %s811_s18, 4  ;;  %vm191_vm0 = vcmask 130048   ;;  %v705_v1 = vmov 0.0   ;;  %vm239_vm1 = vcmask 64512  }
  0x2d   : > { %207 = vxpose.xlu0.b32.start.end [1/1] (short) (narrow) %v194_v0, 16  ;;  %489 = vmatprep.subr.mxu0 %v194_v0  ;;  %s820_s27 = scalar_lea.vmem [#allocation6], %s476_s26  ;;  %v197_v4 = vsel %vm191_vm0, %v194_v0, 0.0  ;;  %vm189_vm2 = vcmask 122880   ;;  %s176_s21 = scalar_lea.vmem [#allocation5], %s811_s18 }
  0x2e   : > { %490 = vmatpush3.msra.mxu0 %v194_v0  ;;  %193 = vst.msk [vmem:[%s820_s27 + $0x8] sm:$0xff] %vm191_vm0, %v705_v1  ;;  %192 = vst.msk [vmem:[%s820_s27] sm:$0xff] %vm191_vm0, %v705_v1  ;;  %v198_v5 = vrot.slane %v197_v4, 4  ;;  %s480_s28 = sshll.u32 %s694_s12, 4  ;;  %s345_s29 = sshll.u32 %s176_s21, 4  ;;  %s346_s29 = int_to_ptr.vmem [resolvable:$true] %s345_s29 }
  0x2f   : > { %190 = vst.msk [vmem:[%s176_s21] sm:$0x1] %vm189_vm2, %v705_v1  ;;  %s343_s4 = scalar_lea.hbm %s907_s1, %s480_s28  ;;  %s328_s5 = scalar_lea.sflag [#allocation4], %s811_s18 }
  0x30   : > { %v199_v6 = vadd.f32 %v198_v5, %v197_v4  ;;  %s592_s6 = scalar_lea.vmem %s346_s29, 16  ;;  %s706_s7 = smov [#allocation5]  }
  0x31   : > { %p593_p8 = scmp.ne.s32.totalorder %s346_s29, %s592_s6  ;;  %s596_s8 = sshll.u32 %s706_s7, 4  ;;  %s597_s8 = int_to_ptr.vmem [resolvable:$false] %s596_s8 }
  0x32   : > { %v200_v7 = vrot.slane %v199_v6, 2  ;;  %s598_s15 = scalar_lea.vmem %s597_s8, 32  ;;  %p599_p0 = scmp.lt.s32.totalorder %s346_s29, %s597_s8 }
  0x33   : > { %p594_p11 = pnand %p593_p8, %p776_p9  ;;  %p600_p1 = scmp.lt.s32.totalorder %s598_s15, %s592_s6 }
  0x34   : > { %v201_v8 = vadd.f32 %v200_v7, %v199_v6 }
  0x35   : > { %p595_p12 = pneg %p594_p11  ;;  %p601_p2 = por %p600_p1, %p599_p0 }
  0x36   : > { %v202_v9 = vrot.slane %v201_v8, 1  ;;  %v195_v11 = vld [vmem:[%s176_s21] sm:$0x1] }
  0x37   : > { %p602_p3 = pnand %p601_p2, %p595_p12 }
  0x38   : > { %v203_v10 = vadd.f32 %v202_v9, %v201_v8 }
  0x3a   : > { %v204_v12 = vadd.f32 %v203_v10, %v195_v11 }
  0x3c   : > { %206 = vst.msk [vmem:[%s176_s21] sm:$0x1] %vm189_vm2, %v204_v12 }
  0xa9   : > { %v223_v2 = vpop.trf.xlu0 }
  0xaa   : > { %491 = vmatprep.mubr.msk.f32.mxu0 %vm239_vm1, %v223_v2 }
  0xad   : > { %v224_v3 = vpop.trf.xlu0 }
  0xae   : > { %492 = vmatmul.mubr.msk.f32.vlgmr.msra.gmra.mxu0 %vm239_vm1, %v224_v3 }
  0xaf   : > { %605 = shalt.err (!%p602_p3)
}
  0xb0   : > { %s606_s16 = scalar_lea.hbm %s343_s4, 16  ;;  %s610_s25 = scalar_lea.hbm %s907_s1, 32 }
  0xb1   : > { %p607_p5 = scmp.ne.s32.totalorder %s343_s4, %s606_s16  ;;  %p611_p10 = scmp.lt.s32.totalorder %s343_s4, %s907_s1 }
  0xb2   : > { %p612_p4 = scmp.lt.s32.totalorder %s610_s25, %s606_s16 }
  0xb3   : > { %p608_p6 = pnand %p607_p5, %p776_p9 }
  0xb4   : > { %p613_p13 = por %p612_p4, %p611_p10 }
  0xb5   : > { %p609_p7 = pneg %p608_p6 }
  0xb7   : > { %p614_p8 = pnand %p613_p13, %p609_p7 }
  0xb9   : > { %617 = shalt.err (!%p614_p8)
}
  0xba   : > { %496 = dma.vmem_to_hbm [thread:$0]  (%p776_p9), %s346_s29, 16, %s343_s4, %s328_s5   ;;  %v322_v13 = vld [vmem:[%s820_s27 + $0x8] sm:$0xff]  ;;  %v321_v15 = vld [vmem:[%s820_s27] sm:$0xff] }
  0xbb   : > { %s485_s28 = sshll.u32 %s694_s12, 8  ;;  %s358_s30 = sshll.u32 %s820_s27, 4  ;;  %s854_s30 = int_to_ptr.vmem [resolvable:$true] %s358_s30 }
  0xbc   : > { %s852_s7 = scalar_lea.hbm %s908_s2, %s485_s28  ;;  %s332_s12 = scalar_lea.sflag [#allocation7], %s811_s18 }
  0xbd   : > { %s618_s29 = scalar_lea.vmem %s854_s30, 256  ;;  %s707_s4 = smov [#allocation6]  }
  0xbe   : > { %p619_p11 = scmp.ne.s32.totalorder %s854_s30, %s618_s29  ;;  %s622_s5 = sshll.u32 %s707_s4, 4  ;;  %s623_s5 = int_to_ptr.vmem [resolvable:$false] %s622_s5 }
  0xbf   : > { %s624_s8 = scalar_lea.vmem %s623_s5, 512  ;;  %p625_p1 = scmp.lt.s32.totalorder %s854_s30, %s623_s5 }
  0xc0   : > { %p620_p12 = pnand %p619_p11, %p776_p9  ;;  %p626_p2 = scmp.lt.s32.totalorder %s624_s8, %s618_s29 }
  0xc2   : > { %p621_p0 = pneg %p620_p12  ;;  %p627_p3 = por %p626_p2, %p625_p1 }
  0xc4   : > { %p628_p5 = pnand %p627_p3, %p621_p0 }
 0x16e   : > { %v493_v14 = vpop.f32.mrf.mxu0 }
 0x16f   : > { %v324_v16 = vadd.f32 %v493_v14, %v322_v13 }
 0x170   : > { %v312_v17 = vpop.f32.mrf.mxu0 }
 0x171   : > { %326 = vst.msk [vmem:[%s820_s27 + $0x8] sm:$0xff] %vm191_vm0, %v324_v16  ;;  %v323_v18 = vadd.f32 %v321_v15, %v312_v17 }
 0x173   : > { %325 = vst.msk [vmem:[%s820_s27] sm:$0xff] %vm191_vm0, %v323_v18 }
 0x174   : > { %631 = shalt.err (!%p628_p5)
}
 0x175   : > { %s632_s27 = scalar_lea.hbm %s852_s7, 256  ;;  %s636_s19 = scalar_lea.hbm %s908_s2, 512 }
 0x176   : > { %p633_p6 = scmp.ne.s32.totalorder %s852_s7, %s632_s27  ;;  %p637_p4 = scmp.lt.s32.totalorder %s852_s7, %s908_s2 }
 0x177   : > { %p638_p13 = scmp.lt.s32.totalorder %s636_s19, %s632_s27 }
 0x178   : > { %p634_p7 = pnand %p633_p6, %p776_p9 }
 0x179   : > { %p639_p8 = por %p638_p13, %p637_p4 }
 0x17a   : > { %p635_p10 = pneg %p634_p7 }
 0x17c   : > { %p640_p11 = pnand %p639_p8, %p635_p10 }
 0x17e   : > { %643 = shalt.err (!%p640_p11)
}
 0x17f   : > { %s708_s26 = smov 128   ;;  %s709_s21 = smov 8  }
 0x180   : > { %497 = dma.vmem_to_hbm [thread:$0]  (%p776_p9), %s854_s30, 256, %s852_s7, %s332_s12, %s708_s26, %s708_s26, %s709_s21  }
 0x181 PF: > { %s373_s28 = sand.u32 1, %s682_s9   ;;  %p914_p12 = scmp.ne.s32.totalorder %s912_s24, 0 }
 0x182   : > { %p915_p0 = scmp.ge.s32.totalorder %s702_s14, 2  ;;  %s374_s3 = scalar_lea.sflag [#allocation4], %s373_s28 }
 0x184   : > { %p505_p1 = pnand %p915_p0, %p914_p12 }
 0x186   : > { %p506_p2 = pneg %p505_p1 }
 0x188   : > { %673 = dma.done.wait (%p506_p2), %s374_s3, 16  }
 0x189   : > { %675 = vsyncadd (%p506_p2), %s374_s3, 4294967280  ;;  %s382_s6 = scalar_lea.sflag [#allocation7], %s373_s28 }
 0x18a   : > { %677 = dma.done.wait (%p506_p2), %s382_s6, 256  }
 0x18b   : > { %679 = vsyncadd (%p506_p2), %s382_s6, 4294967040  ;;  %s22_s14 = sadd.s32 1, %s702_s14   ;;  %s916_s9 = smov %s686_s10 }
 0x18c   : > { %p19_p3 = scmp.ge.s32.totalorder %s22_s14, 4   ;;  %s917_s10 = smov %s690_s11 }
 0x18d   : > { %s918_s11 = smov %s781_s23  ;;  %s919_s12 = smov %s698_s13 }
 0x18e   : > { %s920_s13 = smov %s922_s17  ;;  %21 = sbr.rel (!%p19_p3) target bundleno = 8 (0x8), region = 90 }
 0x193   :  { %387 = vsyncpa [#allocation3], 1 }
 0x194   :  { %389 = vsyncpa [#allocation3 + $0x1], 1 }
 0x195   :  { %390 = vsyncpa [#allocation4], 1 }
 0x196   :  { %392 = vsyncpa [#allocation4 + $0x1], 1 }
 0x197   :  { %393 = vsyncpa [#allocation7], 1 }
 0x198   :  { %395 = vsyncpa [#allocation7 + $0x1], 1 }

</bundles_post_ra>
